<compile_context>
chip_gen: v7x
topology: tpu7x:2x2x1
jax: 0.10.0
libtpu: 0.0.40
codegen_flags: <defaults>
</compile_context>

<pallas_src>
import functools

import jax
import jax.numpy as jnp
from jax.experimental import pallas as pl
from jax.experimental.pallas import tpu as pltpu


_ACC_ELEMS = 16 * 1024   # ~16 f32 vregs of accumulator per row band


def _row_bands(H, row_elems):
    """Split H output rows into bands whose f32 accumulator fits in ~16 vregs."""
    rb = max(1, min(H, _ACC_ELEMS // max(1, row_elems)))
    bands = []
    r = 0
    while r < H:
        b = min(rb, H - r)
        bands.append((r, b))
        r += b
    return bands


def _tpu_vmem_capacity_bytes():
    try:
        return int(pltpu.get_tpu_info().vmem_capacity_bytes)
    except Exception:
        return 64 << 20            # conservative fallback (v7x per-core VMEM)


def _vmem_limit_bytes(need, cap):
    """Scoped-VMEM limit: at least what the blocks need (+headroom), never more
    than physical capacity minus compiler headroom."""
    lo = max(need + (2 << 20), min(32 << 20, cap // 2))
    hi = max(cap - (8 << 20), need + (1 << 20))
    return int(min(lo, hi))


# ----------------------------------------------------------------------------
# Path A: channels-last NHWC, C % 128 == 0, grid = (B, C // CT)
# ----------------------------------------------------------------------------
def _dwconv_nhwc_kernel(x_ref, w_ref, b_ref, o_ref, xpad_ref, *, bands):
    """x_ref: (1,H,W,CT)  w_ref: (3,3,CT)  b_ref: (1,CT)  o_ref: (1,H,W,CT)
    xpad_ref: (H+2, W+2, CT) f32 VMEM scratch (zero-bordered padded tile)."""
    _, H, W, CT = o_ref.shape

    # Fused halo: zero the 1-wide borders, copy the input block into the
    # interior with a single dtype upconvert.  (Re-done every grid step:
    # scratch is per-TensorCore and parallel axes may be sharded across cores,
    # so a first-step pl.when guard would be unsafe under megacore.)
    xpad_ref[0:1, :, :] = jnp.zeros((1, W + 2, CT), jnp.float32)
    xpad_ref[H + 1:H + 2, :, :] = jnp.zeros((1, W + 2, CT), jnp.float32)
    xpad_ref[:, 0:1, :] = jnp.zeros((H + 2, 1, CT), jnp.float32)
    xpad_ref[:, W + 1:W + 2, :] = jnp.zeros((H + 2, 1, CT), jnp.float32)
    xpad_ref[1:H + 1, 1:W + 1, :] = x_ref[0].astype(jnp.float32)

    # Hoisted per-tap weights / bias (converted to f32 once, not per tap).
    w_taps = [[w_ref[kh, kw, :].astype(jnp.float32) for kw in range(3)]
              for kh in range(3)]
    bias = b_ref[0, :].astype(jnp.float32)

    # Row-band MAC: accumulator stays register-resident across the 9 taps and
    # is written to the output exactly once per band.
    # TODO(synk): read the kw=1 (center-column) taps straight from x_ref and
    # derive kw=0/2 with pltpu.roll on the XLU to cut the sublane-unaligned
    # scratch loads further.
    for r0, rb in bands:
        acc = xpad_ref[r0:r0 + rb, 0:W, :] * w_taps[0][0] + bias
        for kh in range(3):
            for kw in range(3):
                if kh == 0 and kw == 0:
                    continue
                win = xpad_ref[r0 + kh:r0 + kh + rb, kw:kw + W, :]
                acc = acc + win * w_taps[kh][kw]
        o_ref[0, r0:r0 + rb, :, :] = acc.astype(o_ref.dtype)


def _dwconv_nhwc(x, H, W, weight, bias):
    B, N, C = x.shape
    xi = x.reshape(B, H, W, C)                     # free reshape, NHWC

    # Keep the sublane (W) axis dense: pad W up to a multiple of 8.  Zero
    # right-padding preserves the SAME-conv values of the real columns; the
    # padded output columns are sliced away below.
    Wp = W if W % 8 == 0 else ((W + 7) // 8) * 8
    if Wp != W:
        xi = jnp.pad(xi, ((0, 0), (0, 0), (0, Wp - W), (0, 0)))

    cap = _tpu_vmem_capacity_bytes()
    budget = min(cap // 2, 48 << 20)               # roomy on v5e/v6e, safe on v7x

    def _need(ct):
        blocks = 4 * H * Wp * ct * x.dtype.itemsize      # in+out, double-buffered
        scratch = (H + 2) * (Wp + 2) * ct * 4            # f32 padded tile
        params = 2 * 10 * ct * 4                         # weight + bias blocks
        return blocks + scratch + params

    ct = None
    for cand in (512, 256, 128):                   # prefer bigger DMA granules
        if C % cand == 0 and _need(cand) <= budget:
            ct = cand
            break
    if ct is None:
        # TODO(synk): add an H-row grid axis with a halo'd manual copy so very
        # large feature maps stay within VMEM instead of relying on the limit.
        ct = 128

    bands = _row_bands(H, Wp * ct)
    kern = functools.partial(_dwconv_nhwc_kernel, bands=bands)

    out = pl.pallas_call(
        kern,
        out_shape=jax.ShapeDtypeStruct((B, H, Wp, C), x.dtype),
        grid=(B, C // ct),
        in_specs=[
            pl.BlockSpec((1, H, Wp, ct), lambda b, c: (b, 0, 0, c)),
            pl.BlockSpec((3, 3, ct), lambda b, c: (0, 0, c)),
            pl.BlockSpec((1, ct), lambda b, c: (0, c)),
        ],
        out_specs=pl.BlockSpec((1, H, Wp, ct), lambda b, c: (b, 0, 0, c)),
        scratch_shapes=[pltpu.VMEM((H + 2, Wp + 2, ct), jnp.float32)],
        compiler_params=pltpu.CompilerParams(
            dimension_semantics=("parallel", "parallel"),
            vmem_limit_bytes=_vmem_limit_bytes(_need(ct), cap)),
    )(xi, weight, bias.reshape(1, C))

    if Wp != W:
        out = out[:, :, :W, :]
    return out.reshape(B, N, C)


# ----------------------------------------------------------------------------
# Path B: small C — fold W x C onto the lane axis, grid = (B,)
# ----------------------------------------------------------------------------
def _dwconv_folded_kernel(x_ref, w_ref, b_ref, o_ref, xpad_ref, *, C, bands):
    """x_ref: (1,H,W*C)  w_ref: (3,3,W*C) pre-tiled  b_ref: (1,W*C) pre-tiled
    o_ref: (1,H,W*C)  xpad_ref: (H+2, (W+2)*C) f32 VMEM scratch."""
    _, H, WC = o_ref.shape
    WP = WC + 2 * C

    # Fused halo (vertical rows + C-wide horizontal borders), single upconvert.
    xpad_ref[0:1, :] = jnp.zeros((1, WP), jnp.float32)
    xpad_ref[H + 1:H + 2, :] = jnp.zeros((1, WP), jnp.float32)
    xpad_ref[:, 0:C] = jnp.zeros((H + 2, C), jnp.float32)
    xpad_ref[:, WP - C:WP] = jnp.zeros((H + 2, C), jnp.float32)
    xpad_ref[1:H + 1, C:C + WC] = x_ref[0].astype(jnp.float32)

    w_taps = [[w_ref[kh, kw, :].astype(jnp.float32) for kw in range(3)]
              for kh in range(3)]
    bias = b_ref[0, :].astype(jnp.float32)

    # Row-band MAC with register-resident accumulator; kw shift = lane shift.
    for r0, rb in bands:
        acc = xpad_ref[r0:r0 + rb, 0:WC] * w_taps[0][0] + bias
        for kh in range(3):
            for kw in range(3):
                if kh == 0 and kw == 0:
                    continue
                win = xpad_ref[r0 + kh:r0 + kh + rb, kw * C:kw * C + WC]
                acc = acc + win * w_taps[kh][kw]
        o_ref[0, r0:r0 + rb, :] = acc.astype(o_ref.dtype)


def _dwconv_folded(x, H, W, weight, bias):
    B, N, C = x.shape
    WC = W * C
    xf = x.reshape(B, H, WC)                       # free reshape
    wf = jnp.tile(weight, (1, 1, W))               # (3,3,W*C): w[kh,kw,c] at lane j*C+c
    bf = jnp.tile(bias, W).reshape(1, WC)          # (1, W*C)

    cap = _tpu_vmem_capacity_bytes()
    need = (4 * H * WC * x.dtype.itemsize + (H + 2) * (W + 2) * C * 4
            + 2 * 10 * WC * 4)

    bands = _row_bands(H, WC)
    kern = functools.partial(_dwconv_folded_kernel, C=C, bands=bands)
    out = pl.pallas_call(
        kern,
        out_shape=jax.ShapeDtypeStruct((B, H, WC), x.dtype),
        grid=(B,),
        in_specs=[
            pl.BlockSpec((1, H, WC), lambda b: (b, 0, 0)),
            pl.BlockSpec((3, 3, WC), lambda b: (0, 0, 0)),
            pl.BlockSpec((1, WC), lambda b: (0, 0)),
        ],
        out_specs=pl.BlockSpec((1, H, WC), lambda b: (b, 0, 0)),
        scratch_shapes=[pltpu.VMEM((H + 2, (W + 2) * C), jnp.float32)],
        compiler_params=pltpu.CompilerParams(
            dimension_semantics=("parallel",),
            vmem_limit_bytes=_vmem_limit_bytes(need, cap)),
    )(xf, wf, bf)
    return out.reshape(B, N, C)


# ----------------------------------------------------------------------------
# Public wrapper + helpers
# ----------------------------------------------------------------------------
def torch_dw_weight_to_hwc(w_torch_layout):
    """Convert PyTorch depthwise Conv2d weight (C, 1, 3, 3) -> kernel layout (3, 3, C)."""
    assert w_torch_layout.ndim == 4 and w_torch_layout.shape[1:] == (1, 3, 3)
    return jnp.transpose(w_torch_layout[:, 0], (1, 2, 0))


def dwconv_mulit(x, weight, bias, *, H, W):
    """x: (B, N, C), N == H*W; weight: (3, 3, C); bias: (C,). Returns (B, N, C)."""
    B, N, C = x.shape
    assert N == H * W
    assert weight.shape == (3, 3, C)
    assert bias.shape == (C,)
    if C % 128 == 0:
        return _dwconv_nhwc(x, H, W, weight, bias)
    return _dwconv_folded(x, H, W, weight, bias)


def dwconv_mulit_ref(x, H, W, weight, bias):
    """Pure-JAX reference (lax depthwise conv) for correctness check."""
    B, N, C = x.shape
    xi = x.reshape(B, H, W, C)
    w = weight.reshape(3, 3, 1, C)   # HWIO with 1 input channel per group
    out = jax.lax.conv_general_dilated(
        xi, w, window_strides=(1, 1), padding="SAME",
        dimension_numbers=("NHWC", "HWIO", "NHWC"),
        feature_group_count=C, precision=jax.lax.Precision.HIGHEST)
    out = out + bias
    return out.reshape(B, N, C)


if __name__ == "__main__":
    key = jax.random.PRNGKey(0)
    # (B, C, H, W):
    #   case 1: small C (folded lane-dense path, W*C = 128 exactly)
    #   case 2: C % 128 == 0 (channels-last, channel-tiled grid path)
    #   case 3: C % 128 == 0 with W % 8 != 0 (exercises the sublane W-padding)
    cases = [(2, 8, 16, 16), (2, 256, 16, 16), (1, 128, 12, 12)]
    for (B, C, Hs, Ws) in cases:
        N = Hs * Ws
        kx, kwt, kb, key = jax.random.split(key, 4)
        x = jax.random.normal(kx, (B, N, C), dtype=jnp.float32)
        # Parameters generated in PyTorch's (C, 1, 3, 3) layout, then converted.
        w_pt = jax.random.normal(kwt, (C, 1, 3, 3), dtype=jnp.float32) * 0.1
        bias = jax.random.normal(kb, (C,), dtype=jnp.float32) * 0.1
        weight = torch_dw_weight_to_hwc(w_pt)

        fn = jax.jit(functools.partial(dwconv_mulit, H=Hs, W=Ws))
        out = fn(x, weight, bias)
        jax.block_until_ready(out)

        ref = dwconv_mulit_ref(x, Hs, Ws, weight, bias)
        assert out.shape == (B, N, C)
        assert jnp.allclose(out, ref, atol=1e-4, rtol=1e-4), (
            f"mismatch for B={B} C={C} H={Hs} W={Ws}")

    print("KERNEL_OK")
</pallas_src>

<mosaic_0001>
module attributes {stable_mosaic.version = 11 : i64} {
  func.func @_dwconv_folded_kernel(%arg0: i32, %arg1: memref<1x16x128xf32, #tpu.memory_space<vmem>>, %arg2: memref<3x3x128xf32, #tpu.memory_space<vmem>>, %arg3: memref<1x128xf32, #tpu.memory_space<vmem>>, %arg4: memref<1x16x128xf32, #tpu.memory_space<vmem>>, %arg5: memref<18x144xf32, #tpu.memory_space<vmem>>) attributes {dimension_semantics = [#tpu.dimension_semantics<parallel>], iteration_bounds = array<i64: 2>, scalar_prefetch = 0 : i64, scratch_operands = 1 : i64, tpu.core_type = #tpu.core_type<tc>, window_params = [{transform_indices = @transform_0, window_bounds = array<i64: 1, 16, 128>}, {pipeline_mode = #tpu.pipeline_mode<synchronous>, transform_indices = @transform_1, window_bounds = array<i64: 3, 3, 128>}, {pipeline_mode = #tpu.pipeline_mode<synchronous>, transform_indices = @transform_2, window_bounds = array<i64: 1, 128>}, {transform_indices = @transform_3, window_bounds = array<i64: 1, 16, 128>}]} {
    %cst = arith.constant 0.000000e+00 : f32
    %0 = vector.broadcast %cst : f32 to vector<1x144xf32>
    %c0 = arith.constant 0 : index
    %c0_0 = arith.constant 0 : index
    %1 = vector.load %arg5[%c0, %c0_0] : memref<18x144xf32, #tpu.memory_space<vmem>>, vector<1x144xf32>
    tpu.vector_store %arg5[%c0, %c0_0], %0 {strides = array<i32>} : memref<18x144xf32, #tpu.memory_space<vmem>>, vector<1x144xf32>,
    %cst_1 = arith.constant 0.000000e+00 : f32
    %2 = vector.broadcast %cst_1 : f32 to vector<1x144xf32>
    %c17 = arith.constant 17 : index
    %c0_2 = arith.constant 0 : index
    %3 = vector.load %arg5[%c17, %c0_2] : memref<18x144xf32, #tpu.memory_space<vmem>>, vector<1x144xf32>
    tpu.vector_store %arg5[%c17, %c0_2], %2 {strides = array<i32>} : memref<18x144xf32, #tpu.memory_space<vmem>>, vector<1x144xf32>,
    %cst_3 = arith.constant 0.000000e+00 : f32
    %4 = vector.broadcast %cst_3 : f32 to vector<18x8xf32>
    %c0_4 = arith.constant 0 : index
    %c0_5 = arith.constant 0 : index
    %5 = vector.load %arg5[%c0_4, %c0_5] : memref<18x144xf32, #tpu.memory_space<vmem>>, vector<18x8xf32>
    tpu.vector_store %arg5[%c0_4, %c0_5], %4 {strides = array<i32>} : memref<18x144xf32, #tpu.memory_space<vmem>>, vector<18x8xf32>,
    %cst_6 = arith.constant 0.000000e+00 : f32
    %6 = vector.broadcast %cst_6 : f32 to vector<18x8xf32>
    %c0_7 = arith.constant 0 : index
    %c136 = arith.constant 136 : index
    %7 = vector.load %arg5[%c0_7, %c136] : memref<18x144xf32, #tpu.memory_space<vmem>>, vector<18x8xf32>
    tpu.vector_store %arg5[%c0_7, %c136], %6 {strides = array<i32>} : memref<18x144xf32, #tpu.memory_space<vmem>>, vector<18x8xf32>,
    %c0_8 = arith.constant 0 : index
    %c0_9 = arith.constant 0 : index
    %c0_10 = arith.constant 0 : index
    %8 = vector.load %arg1[%c0_8, %c0_9, %c0_10] : memref<1x16x128xf32, #tpu.memory_space<vmem>>, vector<1x16x128xf32>
    %9 = vector.shape_cast %8 : vector<1x16x128xf32> to vector<16x128xf32>
    %c1 = arith.constant 1 : index
    %c8 = arith.constant 8 : index
    %10 = vector.load %arg5[%c1, %c8] : memref<18x144xf32, #tpu.memory_space<vmem>>, vector<16x128xf32>
    tpu.vector_store %arg5[%c1, %c8], %9 {strides = array<i32>} : memref<18x144xf32, #tpu.memory_space<vmem>>, vector<16x128xf32>,
    %c0_11 = arith.constant 0 : index
    %c0_12 = arith.constant 0 : index
    %c0_13 = arith.constant 0 : index
    %11 = vector.load %arg2[%c0_11, %c0_12, %c0_13] : memref<3x3x128xf32, #tpu.memory_space<vmem>>, vector<1x1x128xf32>
    %12 = vector.shape_cast %11 : vector<1x1x128xf32> to vector<128xf32>
    %c0_14 = arith.constant 0 : index
    %c1_15 = arith.constant 1 : index
    %c0_16 = arith.constant 0 : index
    %13 = vector.load %arg2[%c0_14, %c1_15, %c0_16] : memref<3x3x128xf32, #tpu.memory_space<vmem>>, vector<1x1x128xf32>
    %14 = vector.shape_cast %13 : vector<1x1x128xf32> to vector<128xf32>
    %c0_17 = arith.constant 0 : index
    %c2 = arith.constant 2 : index
    %c0_18 = arith.constant 0 : index
    %15 = vector.load %arg2[%c0_17, %c2, %c0_18] : memref<3x3x128xf32, #tpu.memory_space<vmem>>, vector<1x1x128xf32>
    %16 = vector.shape_cast %15 : vector<1x1x128xf32> to vector<128xf32>
    %c1_19 = arith.constant 1 : index
    %c0_20 = arith.constant 0 : index
    %c0_21 = arith.constant 0 : index
    %17 = vector.load %arg2[%c1_19, %c0_20, %c0_21] : memref<3x3x128xf32, #tpu.memory_space<vmem>>, vector<1x1x128xf32>
    %18 = vector.shape_cast %17 : vector<1x1x128xf32> to vector<128xf32>
    %c1_22 = arith.constant 1 : index
    %c1_23 = arith.constant 1 : index
    %c0_24 = arith.constant 0 : index
    %19 = vector.load %arg2[%c1_22, %c1_23, %c0_24] : memref<3x3x128xf32, #tpu.memory_space<vmem>>, vector<1x1x128xf32>
    %20 = vector.shape_cast %19 : vector<1x1x128xf32> to vector<128xf32>
    %c1_25 = arith.constant 1 : index
    %c2_26 = arith.constant 2 : index
    %c0_27 = arith.constant 0 : index
    %21 = vector.load %arg2[%c1_25, %c2_26, %c0_27] : memref<3x3x128xf32, #tpu.memory_space<vmem>>, vector<1x1x128xf32>
    %22 = vector.shape_cast %21 : vector<1x1x128xf32> to vector<128xf32>
    %c2_28 = arith.constant 2 : index
    %c0_29 = arith.constant 0 : index
    %c0_30 = arith.constant 0 : index
    %23 = vector.load %arg2[%c2_28, %c0_29, %c0_30] : memref<3x3x128xf32, #tpu.memory_space<vmem>>, vector<1x1x128xf32>
    %24 = vector.shape_cast %23 : vector<1x1x128xf32> to vector<128xf32>
    %c2_31 = arith.constant 2 : index
    %c1_32 = arith.constant 1 : index
    %c0_33 = arith.constant 0 : index
    %25 = vector.load %arg2[%c2_31, %c1_32, %c0_33] : memref<3x3x128xf32, #tpu.memory_space<vmem>>, vector<1x1x128xf32>
    %26 = vector.shape_cast %25 : vector<1x1x128xf32> to vector<128xf32>
    %c2_34 = arith.constant 2 : index
    %c2_35 = arith.constant 2 : index
    %c0_36 = arith.constant 0 : index
    %27 = vector.load %arg2[%c2_34, %c2_35, %c0_36] : memref<3x3x128xf32, #tpu.memory_space<vmem>>, vector<1x1x128xf32>
    %28 = vector.shape_cast %27 : vector<1x1x128xf32> to vector<128xf32>
    %c0_37 = arith.constant 0 : index
    %c0_38 = arith.constant 0 : index
    %29 = vector.load %arg3[%c0_37, %c0_38] : memref<1x128xf32, #tpu.memory_space<vmem>>, vector<1x128xf32>
    %30 = vector.shape_cast %29 : vector<1x128xf32> to vector<128xf32>
    %c0_39 = arith.constant 0 : index
    %c0_40 = arith.constant 0 : index
    %31 = vector.load %arg5[%c0_39, %c0_40] : memref<18x144xf32, #tpu.memory_space<vmem>>, vector<16x128xf32>
    %32 = vector.shape_cast %12 : vector<128xf32> to vector<1x128xf32>
    %33 = vector.broadcast %32 : vector<1x128xf32> to vector<16x128xf32>
    %34 = arith.mulf %31, %33 : vector<16x128xf32>
    %35 = vector.shape_cast %30 : vector<128xf32> to vector<1x128xf32>
    %36 = vector.broadcast %35 : vector<1x128xf32> to vector<16x128xf32>
    %37 = arith.addf %34, %36 : vector<16x128xf32>
    %c0_41 = arith.constant 0 : index
    %c8_42 = arith.constant 8 : index
    %38 = vector.load %arg5[%c0_41, %c8_42] : memref<18x144xf32, #tpu.memory_space<vmem>>, vector<16x128xf32>
    %39 = vector.shape_cast %14 : vector<128xf32> to vector<1x128xf32>
    %40 = vector.broadcast %39 : vector<1x128xf32> to vector<16x128xf32>
    %41 = arith.mulf %38, %40 : vector<16x128xf32>
    %42 = arith.addf %37, %41 : vector<16x128xf32>
    %c0_43 = arith.constant 0 : index
    %c16 = arith.constant 16 : index
    %43 = vector.load %arg5[%c0_43, %c16] : memref<18x144xf32, #tpu.memory_space<vmem>>, vector<16x128xf32>
    %44 = vector.shape_cast %16 : vector<128xf32> to vector<1x128xf32>
    %45 = vector.broadcast %44 : vector<1x128xf32> to vector<16x128xf32>
    %46 = arith.mulf %43, %45 : vector<16x128xf32>
    %47 = arith.addf %42, %46 : vector<16x128xf32>
    %c1_44 = arith.constant 1 : index
    %c0_45 = arith.constant 0 : index
    %48 = vector.load %arg5[%c1_44, %c0_45] : memref<18x144xf32, #tpu.memory_space<vmem>>, vector<16x128xf32>
    %49 = vector.shape_cast %18 : vector<128xf32> to vector<1x128xf32>
    %50 = vector.broadcast %49 : vector<1x128xf32> to vector<16x128xf32>
    %51 = arith.mulf %48, %50 : vector<16x128xf32>
    %52 = arith.addf %47, %51 : vector<16x128xf32>
    %c1_46 = arith.constant 1 : index
    %c8_47 = arith.constant 8 : index
    %53 = vector.load %arg5[%c1_46, %c8_47] : memref<18x144xf32, #tpu.memory_space<vmem>>, vector<16x128xf32>
    %54 = vector.shape_cast %20 : vector<128xf32> to vector<1x128xf32>
    %55 = vector.broadcast %54 : vector<1x128xf32> to vector<16x128xf32>
    %56 = arith.mulf %53, %55 : vector<16x128xf32>
    %57 = arith.addf %52, %56 : vector<16x128xf32>
    %c1_48 = arith.constant 1 : index
    %c16_49 = arith.constant 16 : index
    %58 = vector.load %arg5[%c1_48, %c16_49] : memref<18x144xf32, #tpu.memory_space<vmem>>, vector<16x128xf32>
    %59 = vector.shape_cast %22 : vector<128xf32> to vector<1x128xf32>
    %60 = vector.broadcast %59 : vector<1x128xf32> to vector<16x128xf32>
    %61 = arith.mulf %58, %60 : vector<16x128xf32>
    %62 = arith.addf %57, %61 : vector<16x128xf32>
    %c2_50 = arith.constant 2 : index
    %c0_51 = arith.constant 0 : index
    %63 = vector.load %arg5[%c2_50, %c0_51] : memref<18x144xf32, #tpu.memory_space<vmem>>, vector<16x128xf32>
    %64 = vector.shape_cast %24 : vector<128xf32> to vector<1x128xf32>
    %65 = vector.broadcast %64 : vector<1x128xf32> to vector<16x128xf32>
    %66 = arith.mulf %63, %65 : vector<16x128xf32>
    %67 = arith.addf %62, %66 : vector<16x128xf32>
    %c2_52 = arith.constant 2 : index
    %c8_53 = arith.constant 8 : index
    %68 = vector.load %arg5[%c2_52, %c8_53] : memref<18x144xf32, #tpu.memory_space<vmem>>, vector<16x128xf32>
    %69 = vector.shape_cast %26 : vector<128xf32> to vector<1x128xf32>
    %70 = vector.broadcast %69 : vector<1x128xf32> to vector<16x128xf32>
    %71 = arith.mulf %68, %70 : vector<16x128xf32>
    %72 = arith.addf %67, %71 : vector<16x128xf32>
    %c2_54 = arith.constant 2 : index
    %c16_55 = arith.constant 16 : index
    %73 = vector.load %arg5[%c2_54, %c16_55] : memref<18x144xf32, #tpu.memory_space<vmem>>, vector<16x128xf32>
    %74 = vector.shape_cast %28 : vector<128xf32> to vector<1x128xf32>
    %75 = vector.broadcast %74 : vector<1x128xf32> to vector<16x128xf32>
    %76 = arith.mulf %73, %75 : vector<16x128xf32>
    %77 = arith.addf %72, %76 : vector<16x128xf32>
    %c0_56 = arith.constant 0 : index
    %c0_57 = arith.constant 0 : index
    %c0_58 = arith.constant 0 : index
    %78 = vector.load %arg4[%c0_56, %c0_57, %c0_58] : memref<1x16x128xf32, #tpu.memory_space<vmem>>, vector<1x16x128xf32>
    %79 = vector.shape_cast %78 : vector<1x16x128xf32> to vector<16x128xf32>
    %80 = vector.shape_cast %77 : vector<16x128xf32> to vector<1x16x128xf32>
    tpu.vector_store %arg4[%c0_56, %c0_57, %c0_58], %80 {strides = array<i32>} : memref<1x16x128xf32, #tpu.memory_space<vmem>>, vector<1x16x128xf32>,
    return
  }
  func.func @transform_0(%arg0: i32) -> (i32, i32, i32) {
    %c0_i32 = arith.constant 0 : i32
    %c0_i32_0 = arith.constant 0 : i32
    %c0_i32_1 = arith.constant 0 : i32
    return %arg0, %c0_i32, %c0_i32_0 : i32, i32, i32
  }
  func.func @transform_1(%arg0: i32) -> (i32, i32, i32) {
    %c0_i32 = arith.constant 0 : i32
    %c0_i32_0 = arith.constant 0 : i32
    %c0_i32_1 = arith.constant 0 : i32
    %c0_i32_2 = arith.constant 0 : i32
    return %c0_i32, %c0_i32_0, %c0_i32_1 : i32, i32, i32
  }
  func.func @transform_2(%arg0: i32) -> (i32, i32) {
    %c0_i32 = arith.constant 0 : i32
    %c0_i32_0 = arith.constant 0 : i32
    %c0_i32_1 = arith.constant 0 : i32
    return %c0_i32, %c0_i32_0 : i32, i32
  }
  func.func @transform_3(%arg0: i32) -> (i32, i32, i32) {
    %c0_i32 = arith.constant 0 : i32
    %c0_i32_0 = arith.constant 0 : i32
    %c0_i32_1 = arith.constant 0 : i32
    return %arg0, %c0_i32, %c0_i32_0 : i32, i32, i32
  }
}

</mosaic_0001>

<bundles_post_ra>
// kernel: tile.14
= control target key start
LH: loop header
LB: loop body
LE: loop exit
PB: predicated region body
PF: predicated region fallthrough
CT: control target
= control target key end

     0   :  { %s633_s10 = smov 112   ;;  %s634_s11 = smov 120   ;;  %vm6_vm0 = vcmask 1043458   ;;  %vm10_vm1 = vcmask 1045508   ;;  %vm14_vm2 = vcmask 1047558   ;;  %vm16_vm3 = vcmask 64512   ;;  %s961_s0 = inlined_call_operand.vmem [shape: f32[3,3,16,8], index: 0, kind: input, shape index: {}]   ;;  %s962_s1 = inlined_call_operand.vmem [shape: f32[3,3,128], index: 1, kind: output, shape index: {}]  }
   0x1   :  { %v550_v0 = vld [vmem:[%s961_s0 + $0x8e] sm:$0x1]   ;;  %v545_v1 = vld [vmem:[%s961_s0 + $0x8f] sm:$0x1]   ;;  %s61_s12 = smov 3  ;;  %s64_s13 = smov 12 }
   0x2   :  { %88 = vrot.lane.b32.xlu1 %v550_v0, %s633_s10  ;;  %55 = vrot.lane.b32.xlu0 %v545_v1, %s634_s11  ;;  %v546_v2 = vld [vmem:[%s961_s0 + $0xe] ss:$16 sm:%s61_s12]   ;;  %s69_s18 = smov 48  ;;  %s74_s19 = smov 192  ;;  %vm47_vm4 = vcmask 1048512   ;;  %vm80_vm5 = vcmask 982912  }
   0x3   :  { %v547_v3 = vld [vmem:[%s961_s0 + $0xe] ss:$16 sm:%s64_s13]   ;;  %s28_s24 = smov 3  ;;  %s31_s25 = smov 12  ;;  %v555_v15 = vld [vmem:[%s961_s0 + $0x8d] sm:$0x1]  }
   0x4   :  { %v67_v4 = vsel %vm6_vm0, %v547_v3, %v546_v2  ;;  %v548_v5 = vld [vmem:[%s961_s0 + $0xe] ss:$16 sm:%s69_s18]   ;;  %v541_v8 = vld [vmem:[%s961_s0 + $0xf] ss:$16 sm:%s28_s24]   ;;  %s36_s30 = smov 48  ;;  %s41_s2 = smov 192 }
   0x5   :  { %v549_v6 = vld [vmem:[%s961_s0 + $0xe] ss:$16 sm:%s74_s19]   ;;  %v72_v7 = vsel %vm10_vm1, %v548_v5, %v67_v4  ;;  %v542_v9 = vld [vmem:[%s961_s0 + $0xf] ss:$16 sm:%s31_s25]   ;;  %s94_s7 = smov 3  ;;  %s97_s13 = smov 12 }
   0x6   :  { %v77_v10 = vsel %vm14_vm2, %v549_v6, %v72_v7  ;;  %v34_v11 = vsel %vm6_vm0, %v542_v9, %v541_v8  ;;  %v543_v12 = vld [vmem:[%s961_s0 + $0xf] ss:$16 sm:%s36_s30]   ;;  %v551_v16 = vld [vmem:[%s961_s0 + $0xd] ss:$16 sm:%s94_s7]   ;;  %s102_s14 = smov 48  ;;  %s107_s19 = smov 192 }
   0x7   :  { %v544_v13 = vld [vmem:[%s961_s0 + $0xf] ss:$16 sm:%s41_s2]   ;;  %78 = vrot.lane.b32.xlu1 %v77_v10, %s633_s10  ;;  %v39_v14 = vsel %vm10_vm1, %v543_v12, %v34_v11  ;;  %s127_s21 = smov 3  ;;  %s130_s22 = smov 12  ;;  %v560_v26 = vld [vmem:[%s961_s0 + $0x8c] sm:$0x1]  }
   0x8   :  { %v44_v17 = vsel %vm14_vm2, %v544_v13, %v39_v14  ;;  %v552_v18 = vld [vmem:[%s961_s0 + $0xd] ss:$16 sm:%s97_s13]   ;;  %v556_v23 = vld [vmem:[%s961_s0 + $0xc] ss:$16 sm:%s127_s21]   ;;  %s135_s27 = smov 48  ;;  %s140_s28 = smov 192 }
   0x9   :  { %v553_v19 = vld [vmem:[%s961_s0 + $0xd] ss:$16 sm:%s102_s14]   ;;  %45 = vrot.lane.b32.xlu0 %v44_v17, %s634_s11  ;;  %v100_v20 = vsel %vm6_vm0, %v552_v18, %v551_v16  ;;  %s635_s29 = smov 104   ;;  %s160_s5 = smov 3  ;;  %v565_v37 = vld [vmem:[%s961_s0 + $0x8b] sm:$0x1]  }
   0xa   :  { %v554_v21 = vld [vmem:[%s961_s0 + $0xd] ss:$16 sm:%s107_s19]   ;;  %v105_v22 = vsel %vm10_vm1, %v553_v19, %v100_v20  ;;  %v557_v24 = vld [vmem:[%s961_s0 + $0xc] ss:$16 sm:%s130_s22]   ;;  %s163_s10 = smov 12  ;;  %s168_s12 = smov 48 }
   0xb   :  { %121 = vrot.lane.b32.xlu1 %v555_v15, %s635_s29  ;;  %v110_v25 = vsel %vm14_vm2, %v554_v21, %v105_v22  ;;  %v133_v27 = vsel %vm6_vm0, %v557_v24, %v556_v23  ;;  %v558_v28 = vld [vmem:[%s961_s0 + $0xc] ss:$16 sm:%s135_s27]   ;;  %s173_s15 = smov 192  ;;  %s193_s11 = smov 3  ;;  %v570_v46 = vld [vmem:[%s961_s0 + $0x8a] sm:$0x1]  }
   0xc   :  { %v138_v29 = vsel %vm10_vm1, %v558_v28, %v133_v27  ;;  %v559_v30 = vld [vmem:[%s961_s0 + $0xc] ss:$16 sm:%s140_s28]   ;;  %v561_v31 = vld [vmem:[%s961_s0 + $0xb] ss:$16 sm:%s160_s5]   ;;  %s196_s20 = smov 12  ;;  %s636_s21 = smov 96  }
   0xd   :  { %111 = vrot.lane.b32.xlu0 %v110_v25, %s635_s29  ;;  %v562_v32 = vld [vmem:[%s961_s0 + $0xb] ss:$16 sm:%s163_s10]   ;;  %v143_v33 = vsel %vm14_vm2, %v559_v30, %v138_v29  ;;  %s201_s26 = smov 48  ;;  %s206_s2 = smov 192  ;;  %v575_v54 = vld [vmem:[%s961_s0 + $0x89] sm:$0x1]  }
   0xe   :  { %v166_v34 = vsel %vm6_vm0, %v562_v32, %v561_v31  ;;  %v563_v35 = vld [vmem:[%s961_s0 + $0xb] ss:$16 sm:%s168_s12]   ;;  %v566_v39 = vld [vmem:[%s961_s0 + $0xa] ss:$16 sm:%s193_s11]   ;;  %s226_s3 = smov 3  ;;  %s229_s4 = smov 12 }
   0xf   :  { %v564_v36 = vld [vmem:[%s961_s0 + $0xb] ss:$16 sm:%s173_s15]   ;;  %154 = vrot.lane.b32.xlu1 %v560_v26, %s636_s21  ;;  %v171_v38 = vsel %vm10_vm1, %v563_v35, %v166_v34  ;;  %s234_s5 = smov 48  ;;  %s637_s10 = smov 88   ;;  %v580_v62 = vld [vmem:[%s961_s0 + $0x88] sm:$0x1]  }
  0x10   :  { %v567_v40 = vld [vmem:[%s961_s0 + $0xa] ss:$16 sm:%s196_s20]   ;;  %v176_v43 = vsel %vm14_vm2, %v564_v36, %v171_v38  ;;  %v571_v44 = vld [vmem:[%s961_s0 + $0x9] ss:$16 sm:%s226_s3]   ;;  %s259_s16 = smov 3  ;;  %s262_s17 = smov 12 }
  0x11   :  { %v568_v41 = vld [vmem:[%s961_s0 + $0xa] ss:$16 sm:%s201_s26]   ;;  %144 = vrot.lane.b32.xlu0 %v143_v33, %s636_s21  ;;  %v199_v42 = vsel %vm6_vm0, %v567_v40, %v566_v39  ;;  %s239_s11 = smov 192  ;;  %s267_s24 = smov 48  ;;  %v585_v6 = vld [vmem:[%s961_s0 + $0x87] sm:$0x1]  }
  0x12   :  { %v572_v45 = vld [vmem:[%s961_s0 + $0x9] ss:$16 sm:%s229_s4]   ;;  %v204_v47 = vsel %vm10_vm1, %v568_v41, %v199_v42  ;;  %v569_v48 = vld [vmem:[%s961_s0 + $0xa] ss:$16 sm:%s206_s2]   ;;  %s292_s25 = smov 3  ;;  %s295_s26 = smov 12 }
  0x13   :  { %187 = vrot.lane.b32.xlu1 %v565_v37, %s637_s10  ;;  %v232_v49 = vsel %vm6_vm0, %v572_v45, %v571_v44  ;;  %v573_v50 = vld [vmem:[%s961_s0 + $0x9] ss:$16 sm:%s234_s5]   ;;  %v209_v53 = vsel %vm14_vm2, %v569_v48, %v204_v47  ;;  %s638_s27 = smov 80   ;;  %s272_s5 = smov 192  ;;  %v590_v14 = vld [vmem:[%s961_s0 + $0x86] sm:$0x1]  }
  0x14   :  { %v576_v51 = vld [vmem:[%s961_s0 + $0x8] ss:$16 sm:%s259_s16]   ;;  %v237_v55 = vsel %vm10_vm1, %v573_v50, %v232_v49  ;;  %v574_v56 = vld [vmem:[%s961_s0 + $0x9] ss:$16 sm:%s239_s11]   ;;  %s325_s12 = smov 3  ;;  %s328_s13 = smov 12 }
  0x15   :  { %177 = vrot.lane.b32.xlu0 %v176_v43, %s637_s10  ;;  %v577_v52 = vld [vmem:[%s961_s0 + $0x8] ss:$16 sm:%s262_s17]   ;;  %s300_s10 = smov 48  ;;  %v242_v61 = vsel %vm14_vm2, %v574_v56, %v237_v55  ;;  %s639_s14 = smov 72   ;;  %v540_v17 = vld [vmem:[%s961_s0 + $0x80] sm:$0x1]  }
  0x16   :  { %v265_v57 = vsel %vm6_vm0, %v577_v52, %v576_v51  ;;  %v578_v58 = vld [vmem:[%s961_s0 + $0x8] ss:$16 sm:%s267_s24]   ;;  %v581_v59 = vld [vmem:[%s961_s0 + $0x7] ss:$16 sm:%s292_s25]   ;;  %s305_s20 = smov 192  ;;  %s333_s25 = smov 48 }
  0x17   :  { %220 = vrot.lane.b32.xlu1 %v570_v46, %s638_s27  ;;  %v582_v60 = vld [vmem:[%s961_s0 + $0x7] ss:$16 sm:%s295_s26]   ;;  %v270_v63 = vsel %vm10_vm1, %v578_v58, %v265_v57  ;;  %s358_s26 = smov 3  ;;  %s640_s28 = smov 64   ;;  %26 = vst.msk [vmem:[#allocation0 + $0x12] sm:$0x1] %vm16_vm3, %v540_v17  }
  0x18   :  { %v579_v0 = vld [vmem:[%s961_s0 + $0x8] ss:$16 sm:%s272_s5]   ;;  %v298_v1 = vsel %vm6_vm0, %v582_v60, %v581_v59  ;;  %v583_v2 = vld [vmem:[%s961_s0 + $0x7] ss:$16 sm:%s300_s10]   ;;  %s338_s6 = smov 192  ;;  %s394_s16 = smov 12 }
  0x19   :  { %210 = vrot.lane.b32.xlu0 %v209_v53, %s638_s27  ;;  %v586_v3 = vld [vmem:[%s961_s0 + $0x6] ss:$16 sm:%s325_s12]   ;;  %v275_v5 = vsel %vm14_vm2, %v579_v0, %v270_v63  ;;  %s361_s27 = smov 12  ;;  %v303_v7 = vsel %vm10_vm1, %v583_v2, %v298_v1  ;;  %s366_s12 = smov 48  ;;  %v595_v23 = vld [vmem:[%s961_s0 + $0x85] sm:$0x1]  }
  0x1a   :  { %v587_v4 = vld [vmem:[%s961_s0 + $0x6] ss:$16 sm:%s328_s13]   ;;  %v584_v8 = vld [vmem:[%s961_s0 + $0x7] ss:$16 sm:%s305_s20]   ;;  %s391_s13 = smov 3  ;;  %s641_s17 = smov 56  }
  0x1b   :  { %253 = vrot.lane.b32.xlu1 %v575_v54, %s639_s14  ;;  %v331_v9 = vsel %vm6_vm0, %v587_v4, %v586_v3  ;;  %v588_v10 = vld [vmem:[%s961_s0 + $0x6] ss:$16 sm:%s333_s25]   ;;  %v308_v13 = vsel %vm14_vm2, %v584_v8, %v303_v7  ;;  %s371_s23 = smov 192  ;;  %s424_s29 = smov 3  ;;  %v600_v34 = vld [vmem:[%s961_s0 + $0x84] sm:$0x1]  }
  0x1c   :  { %v591_v11 = vld [vmem:[%s961_s0 + $0x5] ss:$16 sm:%s358_s26]   ;;  %v336_v15 = vsel %vm10_vm1, %v588_v10, %v331_v9  ;;  %v589_v16 = vld [vmem:[%s961_s0 + $0x6] ss:$16 sm:%s338_s6]   ;;  %s404_s30 = smov 192  ;;  %s427_s2 = smov 12 }
  0x1d   :  { %243 = vrot.lane.b32.xlu0 %v242_v61, %s639_s14  ;;  %v592_v12 = vld [vmem:[%s961_s0 + $0x5] ss:$16 sm:%s361_s27]   ;;  %v341_v22 = vsel %vm14_vm2, %v589_v16, %v336_v15  ;;  %s642_s3 = smov 48   ;;  %s432_s8 = smov 48  ;;  %v605_v45 = vld [vmem:[%s961_s0 + $0x83] sm:$0x1]  }
  0x1e   :  { %v364_v18 = vsel %vm6_vm0, %v592_v12, %v591_v11  ;;  %v593_v19 = vld [vmem:[%s961_s0 + $0x5] ss:$16 sm:%s366_s12]   ;;  %v596_v20 = vld [vmem:[%s961_s0 + $0x4] ss:$16 sm:%s391_s13]   ;;  %s8_s9 = smov 48  ;;  %s457_s15 = smov 3 }
  0x1f   :  { %286 = vrot.lane.b32.xlu1 %v580_v62, %s640_s28  ;;  %v597_v21 = vld [vmem:[%s961_s0 + $0x4] ss:$16 sm:%s394_s16]   ;;  %v369_v24 = vsel %vm10_vm1, %v593_v19, %v364_v18  ;;  %s2_s16 = smov 3  ;;  %s12_s20 = smov 192  ;;  %v610_v56 = vld [vmem:[%s961_s0 + $0x82] sm:$0x1]  }
  0x20   :  { %v594_v25 = vld [vmem:[%s961_s0 + $0x5] ss:$16 sm:%s371_s23]   ;;  %v397_v26 = vsel %vm6_vm0, %v597_v21, %v596_v20  ;;  %v601_v28 = vld [vmem:[%s961_s0 + $0x3] ss:$16 sm:%s424_s29]   ;;  %s4_s21 = smov 12  ;;  %s460_s24 = smov 12 }
  0x21   :  { %276 = vrot.lane.b32.xlu0 %v275_v5, %s640_s28  ;;  %s399_s28 = smov 48  ;;  %v599_v29 = vld [vmem:[%s961_s0 + $0x4] ss:$16 sm:%s404_s30]   ;;  %v374_v31 = vsel %vm14_vm2, %v594_v25, %v369_v24  ;;  %s643_s27 = smov 40   ;;  %v615_v62 = vld [vmem:[%s961_s0 + $0x81] sm:$0x1]  }
  0x22   :  { %v598_v27 = vld [vmem:[%s961_s0 + $0x4] ss:$16 sm:%s399_s28]   ;;  %v602_v30 = vld [vmem:[%s961_s0 + $0x3] ss:$16 sm:%s427_s2]   ;;  %s437_s5 = smov 192  ;;  %s465_s13 = smov 48 }
  0x23   :  { %319 = vrot.lane.b32.xlu1 %v585_v6, %s641_s17  ;;  %v603_v32 = vld [vmem:[%s961_s0 + $0x3] ss:$16 sm:%s432_s8]   ;;  %v402_v35 = vsel %vm10_vm1, %v598_v27, %v397_v26  ;;  %v430_v38 = vsel %vm6_vm0, %v602_v30, %v601_v28  ;;  %s490_s14 = smov 3  ;;  %s470_s22 = smov 192  ;;  %vm113_vm6 = vcmask 917312   ;;  %vm146_vm7 = vcmask 851712  }
  0x24   :  { %v9_v33 = vld [vmem:[%s961_s0] ss:$16 sm:%s8_s9]   ;;  %v606_v36 = vld [vmem:[%s961_s0 + $0x2] ss:$16 sm:%s457_s15]   ;;  %v407_v43 = vsel %vm14_vm2, %v599_v29, %v402_v35  ;;  %s493_s15 = smov 12  ;;  %v435_v46 = vsel %vm10_vm1, %v603_v32, %v430_v38  ;;  %s645_s28 = smov 24  }
  0x25   :  { %309 = vrot.lane.b32.xlu0 %v308_v13, %s641_s17  ;;  %v3_v37 = vld [vmem:[%s961_s0] ss:$16 sm:%s2_s16]   ;;  %s644_s16 = smov 32   ;;  %s503_s6 = smov 192  ;;  %vm179_vm8 = vcmask 786112   ;;  %vm212_vm9 = vcmask 720512  }
  0x26   :  { %v13_v39 = vld [vmem:[%s961_s0] ss:$16 sm:%s12_s20]   ;;  %v607_v41 = vld [vmem:[%s961_s0 + $0x2] ss:$16 sm:%s460_s24]   ;;  %s646_s7 = smov 16   ;;  %vm245_vm10 = vcmask 654912  }
  0x27   :  { %352 = vrot.lane.b32.xlu1 %v590_v14, %s642_s3  ;;  %v5_v40 = vld [vmem:[%s961_s0] ss:$16 sm:%s4_s21]   ;;  %v463_v49 = vsel %vm6_vm0, %v607_v41, %v606_v36  ;;  %vm278_vm11 = vcmask 589312   ;;  %vm311_vm12 = vcmask 523712   ;;  %vm344_vm13 = vcmask 458112  }
  0x28   :  { %v7_v42 = vsel %vm6_vm0, %v5_v40, %v3_v37  ;;  %v604_v47 = vld [vmem:[%s961_s0 + $0x3] ss:$16 sm:%s437_s5]   ;;  %v608_v50 = vld [vmem:[%s961_s0 + $0x2] ss:$16 sm:%s465_s13]   ;;  %vm377_vm14 = vcmask 392512   ;;  %vm410_vm15 = vcmask 326912  }
  0x29   :  { %342 = vrot.lane.b32.xlu0 %v341_v22, %s642_s3  ;;  %v11_v44 = vsel %vm10_vm1, %v9_v33, %v7_v42  ;;  %v611_v51 = vld [vmem:[%s961_s0 + $0x1] ss:$16 sm:%s490_s14]   ;;  %v440_v53 = vsel %vm14_vm2, %v604_v47, %v435_v46  ;;  %v468_v54 = vsel %vm10_vm1, %v608_v50, %v463_v49 }
  0x2a   :  { %v15_v48 = vsel %vm14_vm2, %v13_v39, %v11_v44  ;;  %v612_v52 = vld [vmem:[%s961_s0 + $0x1] ss:$16 sm:%s493_s15]   ;;  %v609_v55 = vld [vmem:[%s961_s0 + $0x2] ss:$16 sm:%s470_s22]  }
  0x2b   :  { %385 = vrot.lane.b32.xlu1 %v595_v23, %s643_s27  ;;  %17 = vst.msk [vmem:[#allocation0] sm:$0x7] %vm16_vm3, %v15_v48   ;;  %19 = vst.msk [vmem:[#allocation0 + $0x5] sm:$0x38] %vm16_vm3, %v15_v48   ;;  %v496_v57 = vsel %vm6_vm0, %v612_v52, %v611_v51  ;;  %v473_v59 = vsel %vm14_vm2, %v609_v55, %v468_v54  ;;  %v614_v61 = vld [vmem:[%s961_s0 + $0x1] ss:$16 sm:%s503_s6]  }
  0x2c   :  { %21 = vst.msk [vmem:[#allocation0 + $0xa] sm:$0xc0] %vm16_vm3, %v15_v48   ;;  %vm443_vm0 = vcmask 261312  }
  0x2d   :  { %375 = vrot.lane.b32.xlu0 %v374_v31, %s643_s27  ;;  %s498_s27 = smov 48 }
  0x2e   :  { %v613_v58 = vld [vmem:[%s961_s0 + $0x1] ss:$16 sm:%s498_s27]   ;;  %s647_s0 = smov 8  }
  0x2f   :  { %418 = vrot.lane.b32.xlu1 %v600_v34, %s644_s16  ;;  %v501_v60 = vsel %vm10_vm1, %v613_v58, %v496_v57  ;;  %vm476_vm1 = vcmask 195712  }
  0x30   :  { %v506_v63 = vsel %vm14_vm2, %v614_v61, %v501_v60  ;;  %vm509_vm2 = vcmask 130112  }
  0x31   :  { %408 = vrot.lane.b32.xlu0 %v407_v43, %s644_s16 }
  0x33   :  { %451 = vrot.lane.b32.xlu1 %v605_v45, %s645_s28 }
  0x35   :  { %441 = vrot.lane.b32.xlu0 %v440_v53, %s645_s28 }
  0x37   :  { %484 = vrot.lane.b32.xlu1 %v610_v56, %s646_s7 }
  0x39   :  { %474 = vrot.lane.b32.xlu0 %v473_v59, %s646_s7 }
  0x3b   :  { %517 = vrot.lane.b32.xlu1 %v615_v62, %s647_s0 }
  0x3d   :  { %507 = vrot.lane.b32.xlu0 %v506_v63, %s647_s0 }
  0x74   :  { %v89_v0 = vpop.permute.xlu1 %88   ;;  %v56_v1 = vpop.permute.xlu0 %55  }
  0x75   :  { %59 = vst.msk [vmem:[#allocation0 + $0x12] sm:$0x1] %vm47_vm4, %v56_v1  }
  0x76   :  { %92 = vst.msk [vmem:[#allocation0 + $0x12] sm:$0x1] %vm80_vm5, %v89_v0  }
  0x79   :  { %v79_v2 = vpop.permute.xlu1 %78  }
  0x7b   :  { %v46_v3 = vpop.permute.xlu0 %45  }
  0x7c   :  { %48 = vst.msk [vmem:[#allocation0] sm:$0x7] %vm47_vm4, %v46_v3   ;;  %50 = vst.msk [vmem:[#allocation0 + $0x5] sm:$0x38] %vm47_vm4, %v46_v3  }
  0x7d   :  { %52 = vst.msk [vmem:[#allocation0 + $0xa] sm:$0xc0] %vm47_vm4, %v46_v3   ;;  %v122_v4 = vpop.permute.xlu1 %121  }
  0x7e   :  { %81 = vst.msk [vmem:[#allocation0] sm:$0x7] %vm80_vm5, %v79_v2   ;;  %83 = vst.msk [vmem:[#allocation0 + $0x5] sm:$0x38] %vm80_vm5, %v79_v2  }
  0x7f   :  { %85 = vst.msk [vmem:[#allocation0 + $0xa] sm:$0xc0] %vm80_vm5, %v79_v2   ;;  %v112_v5 = vpop.permute.xlu0 %111  }
  0x80   :  { %125 = vst.msk [vmem:[#allocation0 + $0x12] sm:$0x1] %vm113_vm6, %v122_v4   ;;  %114 = vst.msk [vmem:[#allocation0] sm:$0x7] %vm113_vm6, %v112_v5  }
  0x81   :  { %116 = vst.msk [vmem:[#allocation0 + $0x5] sm:$0x38] %vm113_vm6, %v112_v5   ;;  %118 = vst.msk [vmem:[#allocation0 + $0xa] sm:$0xc0] %vm113_vm6, %v112_v5   ;;  %v155_v6 = vpop.permute.xlu1 %154  }
  0x82   :  { %158 = vst.msk [vmem:[#allocation0 + $0x12] sm:$0x1] %vm146_vm7, %v155_v6  }
  0x83   :  { %v145_v7 = vpop.permute.xlu0 %144  }
  0x84   :  { %147 = vst.msk [vmem:[#allocation0] sm:$0x7] %vm146_vm7, %v145_v7   ;;  %149 = vst.msk [vmem:[#allocation0 + $0x5] sm:$0x38] %vm146_vm7, %v145_v7  }
  0x85   :  { %151 = vst.msk [vmem:[#allocation0 + $0xa] sm:$0xc0] %vm146_vm7, %v145_v7   ;;  %v188_v8 = vpop.permute.xlu1 %187  }
  0x86   :  { %191 = vst.msk [vmem:[#allocation0 + $0x12] sm:$0x1] %vm179_vm8, %v188_v8  }
  0x87   :  { %v178_v9 = vpop.permute.xlu0 %177  }
  0x88   :  { %180 = vst.msk [vmem:[#allocation0] sm:$0x7] %vm179_vm8, %v178_v9   ;;  %182 = vst.msk [vmem:[#allocation0 + $0x5] sm:$0x38] %vm179_vm8, %v178_v9  }
  0x89   :  { %184 = vst.msk [vmem:[#allocation0 + $0xa] sm:$0xc0] %vm179_vm8, %v178_v9   ;;  %v221_v10 = vpop.permute.xlu1 %220  }
  0x8a   :  { %224 = vst.msk [vmem:[#allocation0 + $0x12] sm:$0x1] %vm212_vm9, %v221_v10  }
  0x8b   :  { %v211_v11 = vpop.permute.xlu0 %210  }
  0x8c   :  { %213 = vst.msk [vmem:[#allocation0] sm:$0x7] %vm212_vm9, %v211_v11   ;;  %215 = vst.msk [vmem:[#allocation0 + $0x5] sm:$0x38] %vm212_vm9, %v211_v11  }
  0x8d   :  { %217 = vst.msk [vmem:[#allocation0 + $0xa] sm:$0xc0] %vm212_vm9, %v211_v11   ;;  %v254_v12 = vpop.permute.xlu1 %253  }
  0x8e   :  { %257 = vst.msk [vmem:[#allocation0 + $0x12] sm:$0x1] %vm245_vm10, %v254_v12  }
  0x8f   :  { %v244_v13 = vpop.permute.xlu0 %243  }
  0x90   :  { %246 = vst.msk [vmem:[#allocation0] sm:$0x7] %vm245_vm10, %v244_v13   ;;  %248 = vst.msk [vmem:[#allocation0 + $0x5] sm:$0x38] %vm245_vm10, %v244_v13  }
  0x91   :  { %250 = vst.msk [vmem:[#allocation0 + $0xa] sm:$0xc0] %vm245_vm10, %v244_v13   ;;  %v287_v14 = vpop.permute.xlu1 %286  }
  0x92   :  { %290 = vst.msk [vmem:[#allocation0 + $0x12] sm:$0x1] %vm278_vm11, %v287_v14  }
  0x93   :  { %v277_v15 = vpop.permute.xlu0 %276  }
  0x94   :  { %279 = vst.msk [vmem:[#allocation0] sm:$0x7] %vm278_vm11, %v277_v15   ;;  %281 = vst.msk [vmem:[#allocation0 + $0x5] sm:$0x38] %vm278_vm11, %v277_v15  }
  0x95   :  { %283 = vst.msk [vmem:[#allocation0 + $0xa] sm:$0xc0] %vm278_vm11, %v277_v15   ;;  %v320_v16 = vpop.permute.xlu1 %319  }
  0x96   :  { %323 = vst.msk [vmem:[#allocation0 + $0x12] sm:$0x1] %vm311_vm12, %v320_v16  }
  0x97   :  { %v310_v17 = vpop.permute.xlu0 %309  }
  0x98   :  { %312 = vst.msk [vmem:[#allocation0] sm:$0x7] %vm311_vm12, %v310_v17   ;;  %314 = vst.msk [vmem:[#allocation0 + $0x5] sm:$0x38] %vm311_vm12, %v310_v17  }
  0x99   :  { %316 = vst.msk [vmem:[#allocation0 + $0xa] sm:$0xc0] %vm311_vm12, %v310_v17   ;;  %v353_v18 = vpop.permute.xlu1 %352  }
  0x9a   :  { %356 = vst.msk [vmem:[#allocation0 + $0x12] sm:$0x1] %vm344_vm13, %v353_v18  }
  0x9b   :  { %v343_v19 = vpop.permute.xlu0 %342  }
  0x9c   :  { %345 = vst.msk [vmem:[#allocation0] sm:$0x7] %vm344_vm13, %v343_v19   ;;  %347 = vst.msk [vmem:[#allocation0 + $0x5] sm:$0x38] %vm344_vm13, %v343_v19  }
  0x9d   :  { %349 = vst.msk [vmem:[#allocation0 + $0xa] sm:$0xc0] %vm344_vm13, %v343_v19   ;;  %v386_v20 = vpop.permute.xlu1 %385  }
  0x9e   :  { %389 = vst.msk [vmem:[#allocation0 + $0x12] sm:$0x1] %vm377_vm14, %v386_v20  }
  0x9f   :  { %v376_v21 = vpop.permute.xlu0 %375  }
  0xa0   :  { %378 = vst.msk [vmem:[#allocation0] sm:$0x7] %vm377_vm14, %v376_v21   ;;  %380 = vst.msk [vmem:[#allocation0 + $0x5] sm:$0x38] %vm377_vm14, %v376_v21  }
  0xa1   :  { %382 = vst.msk [vmem:[#allocation0 + $0xa] sm:$0xc0] %vm377_vm14, %v376_v21   ;;  %v419_v22 = vpop.permute.xlu1 %418  }
  0xa2   :  { %422 = vst.msk [vmem:[#allocation0 + $0x12] sm:$0x1] %vm410_vm15, %v419_v22  }
  0xa3   :  { %v409_v23 = vpop.permute.xlu0 %408  }
  0xa4   :  { %411 = vst.msk [vmem:[#allocation0] sm:$0x7] %vm410_vm15, %v409_v23   ;;  %413 = vst.msk [vmem:[#allocation0 + $0x5] sm:$0x38] %vm410_vm15, %v409_v23  }
  0xa5   :  { %415 = vst.msk [vmem:[#allocation0 + $0xa] sm:$0xc0] %vm410_vm15, %v409_v23   ;;  %v452_v24 = vpop.permute.xlu1 %451  }
  0xa6   :  { %455 = vst.msk [vmem:[#allocation0 + $0x12] sm:$0x1] %vm443_vm0, %v452_v24  }
  0xa7   :  { %v442_v25 = vpop.permute.xlu0 %441  }
  0xa8   :  { %444 = vst.msk [vmem:[#allocation0] sm:$0x7] %vm443_vm0, %v442_v25   ;;  %446 = vst.msk [vmem:[#allocation0 + $0x5] sm:$0x38] %vm443_vm0, %v442_v25  }
  0xa9   :  { %448 = vst.msk [vmem:[#allocation0 + $0xa] sm:$0xc0] %vm443_vm0, %v442_v25   ;;  %v485_v26 = vpop.permute.xlu1 %484  }
  0xaa   :  { %488 = vst.msk [vmem:[#allocation0 + $0x12] sm:$0x1] %vm476_vm1, %v485_v26  }
  0xab   :  { %v475_v27 = vpop.permute.xlu0 %474  }
  0xac   :  { %477 = vst.msk [vmem:[#allocation0] sm:$0x7] %vm476_vm1, %v475_v27   ;;  %479 = vst.msk [vmem:[#allocation0 + $0x5] sm:$0x38] %vm476_vm1, %v475_v27  }
  0xad   :  { %481 = vst.msk [vmem:[#allocation0 + $0xa] sm:$0xc0] %vm476_vm1, %v475_v27   ;;  %v518_v28 = vpop.permute.xlu1 %517  }
  0xae   :  { %521 = vst.msk [vmem:[#allocation0 + $0x12] sm:$0x1] %vm509_vm2, %v518_v28  }
  0xaf   :  { %v508_v29 = vpop.permute.xlu0 %507  }
  0xb0   :  { %510 = vst.msk [vmem:[#allocation0] sm:$0x7] %vm509_vm2, %v508_v29   ;;  %512 = vst.msk [vmem:[#allocation0 + $0x5] sm:$0x38] %vm509_vm2, %v508_v29  }
  0xb1   :  { %514 = vst.msk [vmem:[#allocation0 + $0xa] sm:$0xc0] %vm509_vm2, %v508_v29  }
  0xb7   :  { %v525_v30 = vld [vmem:[#allocation0] sm:$0xf]  ;;  %v529_v31 = vld [vmem:[#allocation0 + $0x8] sm:$0xf] }
  0xb8   :  { %v534_v32 = vld [vmem:[#allocation0 + $0x10] sm:$0xf]  ;;  %527 = vst [vmem:[%s962_s1] sm:$0xf] %v525_v30  ;;  %616 = vst [vmem:[%s962_s1 + $0x4] sm:$0xf] %v529_v31 }
  0xb9   :  { %617 = vst [vmem:[%s962_s1 + $0x8] sm:$0xf] %v534_v32 }

// kernel: tile.18
= control target key start
LH: loop header
LB: loop body
LE: loop exit
PB: predicated region body
PF: predicated region fallthrough
CT: control target
= control target key end

     0   :  { %s28_s0 = inlined_call_operand.vmem [shape: f32[8], index: 0, kind: input, shape index: {}]   ;;  %s29_s1 = inlined_call_operand.vmem [shape: f32[16,8], index: 1, kind: output, shape index: {}]  }
   0x1   :  { %v4_v0 = vld [vmem:[%s28_s0] ss:$0 sm:$0xff] }
   0x2   :  { %5 = vst [vmem:[%s29_s1] sm:$0xff] %v4_v0  ;;  %8 = vst [vmem:[%s29_s1 + $0x8] sm:$0xff] %v4_v0 }

// kernel: tile.19
= control target key start
LH: loop header
LB: loop body
LE: loop exit
PB: predicated region body
PF: predicated region fallthrough
CT: control target
= control target key end

     0   :  { %s131_s10 = smov 120   ;;  %s132_s11 = smov 104   ;;  %vm3_vm0 = vcmask 64512   ;;  %vm9_vm1 = vcmask 1048512   ;;  %vm15_vm2 = vcmask 982912   ;;  %vm21_vm3 = vcmask 917312   ;;  %s207_s0 = inlined_call_operand.vmem [shape: f32[16,8], index: 0, kind: input, shape index: {}]   ;;  %s208_s1 = inlined_call_operand.vmem [shape: f32[1,128], index: 1, kind: output, shape index: {}]  }
   0x1   :  { %v101_v0 = vld [vmem:[%s207_s0 + $0xf] sm:$0x1]   ;;  %v103_v1 = vld [vmem:[%s207_s0 + $0xd] sm:$0x1]   ;;  %v102_v2 = vld [vmem:[%s207_s0 + $0xe] sm:$0x1]  }
   0x2   :  { %7 = vrot.lane.b32.xlu0 %v101_v0, %s131_s10  ;;  %19 = vrot.lane.b32.xlu1 %v103_v1, %s132_s11  ;;  %v104_v3 = vld [vmem:[%s207_s0 + $0xc] sm:$0x1]   ;;  %s133_s16 = smov 112   ;;  %s134_s17 = smov 96   ;;  %v105_v4 = vld [vmem:[%s207_s0 + $0xb] sm:$0x1]  }
   0x3   :  { %v106_v5 = vld [vmem:[%s207_s0 + $0xa] sm:$0x1]   ;;  %v2_v6 = vld [vmem:[%s207_s0] sm:$0x1]   ;;  %s135_s24 = smov 88   ;;  %s136_s25 = smov 80  }
   0x4   :  { %4 = vst.msk [vmem:[#allocation0] sm:$0x1] %vm3_vm0, %v2_v6   ;;  %v107_v7 = vld [vmem:[%s207_s0 + $0x9] sm:$0x1]   ;;  %v108_v8 = vld [vmem:[%s207_s0 + $0x8] sm:$0x1]  }
   0x5   :  { %s137_s30 = smov 72   ;;  %s138_s2 = smov 64   ;;  %v109_v9 = vld [vmem:[%s207_s0 + $0x7] sm:$0x1]   ;;  %v110_v10 = vld [vmem:[%s207_s0 + $0x6] sm:$0x1]  }
   0x6   :  { %13 = vrot.lane.b32.xlu0 %v102_v2, %s133_s16  ;;  %25 = vrot.lane.b32.xlu1 %v104_v3, %s134_s17  ;;  %s139_s7 = smov 56   ;;  %s140_s8 = smov 48   ;;  %v111_v11 = vld [vmem:[%s207_s0 + $0x5] sm:$0x1]   ;;  %v112_v12 = vld [vmem:[%s207_s0 + $0x4] sm:$0x1]  }
   0x7   :  { %s141_s13 = smov 40   ;;  %s142_s14 = smov 32   ;;  %v113_v13 = vld [vmem:[%s207_s0 + $0x3] sm:$0x1]   ;;  %v114_v14 = vld [vmem:[%s207_s0 + $0x2] sm:$0x1]  }
   0x8   :  { %s143_s19 = smov 24   ;;  %s144_s20 = smov 16   ;;  %v115_v15 = vld [vmem:[%s207_s0 + $0x1] sm:$0x1]   ;;  %vm27_vm4 = vcmask 851712   ;;  %vm33_vm5 = vcmask 786112  }
   0x9   :  { %s145_s0 = smov 8   ;;  %vm39_vm6 = vcmask 720512   ;;  %vm45_vm7 = vcmask 654912   ;;  %vm51_vm8 = vcmask 589312   ;;  %vm57_vm9 = vcmask 523712  }
   0xa   :  { %31 = vrot.lane.b32.xlu0 %v105_v4, %s135_s24  ;;  %37 = vrot.lane.b32.xlu1 %v106_v5, %s136_s25  ;;  %vm63_vm10 = vcmask 458112   ;;  %vm69_vm11 = vcmask 392512   ;;  %vm75_vm12 = vcmask 326912   ;;  %vm81_vm13 = vcmask 261312  }
   0xb   :  { %vm87_vm14 = vcmask 195712   ;;  %vm93_vm15 = vcmask 130112  }
   0xe   :  { %43 = vrot.lane.b32.xlu0 %v107_v7, %s137_s30  ;;  %49 = vrot.lane.b32.xlu1 %v108_v8, %s138_s2 }
  0x12   :  { %55 = vrot.lane.b32.xlu0 %v109_v9, %s139_s7  ;;  %61 = vrot.lane.b32.xlu1 %v110_v10, %s140_s8 }
  0x16   :  { %67 = vrot.lane.b32.xlu0 %v111_v11, %s141_s13  ;;  %73 = vrot.lane.b32.xlu1 %v112_v12, %s142_s14 }
  0x1a   :  { %79 = vrot.lane.b32.xlu0 %v113_v13, %s143_s19  ;;  %85 = vrot.lane.b32.xlu1 %v114_v14, %s144_s20 }
  0x1e   :  { %91 = vrot.lane.b32.xlu0 %v115_v15, %s145_s0 }
  0x74   :  { %v8_v16 = vpop.permute.xlu0 %7   ;;  %v20_v17 = vpop.permute.xlu1 %19  }
  0x75   :  { %10 = vst.msk [vmem:[#allocation0] sm:$0x1] %vm9_vm1, %v8_v16  }
  0x78   :  { %v14_v18 = vpop.permute.xlu0 %13   ;;  %v26_v19 = vpop.permute.xlu1 %25  }
  0x79   :  { %16 = vst.msk [vmem:[#allocation0] sm:$0x1] %vm15_vm2, %v14_v18  }
  0x7a   :  { %22 = vst.msk [vmem:[#allocation0] sm:$0x1] %vm21_vm3, %v20_v17  }
  0x7b   :  { %28 = vst.msk [vmem:[#allocation0] sm:$0x1] %vm27_vm4, %v26_v19  }
  0x7c   :  { %v32_v20 = vpop.permute.xlu0 %31   ;;  %v38_v21 = vpop.permute.xlu1 %37  }
  0x7d   :  { %34 = vst.msk [vmem:[#allocation0] sm:$0x1] %vm33_vm5, %v32_v20  }
  0x7e   :  { %40 = vst.msk [vmem:[#allocation0] sm:$0x1] %vm39_vm6, %v38_v21  }
  0x80   :  { %v44_v22 = vpop.permute.xlu0 %43   ;;  %v50_v23 = vpop.permute.xlu1 %49  }
  0x81   :  { %46 = vst.msk [vmem:[#allocation0] sm:$0x1] %vm45_vm7, %v44_v22  }
  0x82   :  { %52 = vst.msk [vmem:[#allocation0] sm:$0x1] %vm51_vm8, %v50_v23  }
  0x84   :  { %v56_v24 = vpop.permute.xlu0 %55   ;;  %v62_v25 = vpop.permute.xlu1 %61  }
  0x85   :  { %58 = vst.msk [vmem:[#allocation0] sm:$0x1] %vm57_vm9, %v56_v24  }
  0x86   :  { %64 = vst.msk [vmem:[#allocation0] sm:$0x1] %vm63_vm10, %v62_v25  }
  0x88   :  { %v68_v26 = vpop.permute.xlu0 %67   ;;  %v74_v27 = vpop.permute.xlu1 %73  }
  0x89   :  { %70 = vst.msk [vmem:[#allocation0] sm:$0x1] %vm69_vm11, %v68_v26  }
  0x8a   :  { %76 = vst.msk [vmem:[#allocation0] sm:$0x1] %vm75_vm12, %v74_v27  }
  0x8c   :  { %v80_v28 = vpop.permute.xlu0 %79   ;;  %v86_v29 = vpop.permute.xlu1 %85  }
  0x8d   :  { %82 = vst.msk [vmem:[#allocation0] sm:$0x1] %vm81_vm13, %v80_v28  }
  0x8e   :  { %88 = vst.msk [vmem:[#allocation0] sm:$0x1] %vm87_vm14, %v86_v29  }
  0x90   :  { %v92_v30 = vpop.permute.xlu0 %91  }
  0x91   :  { %94 = vst.msk [vmem:[#allocation0] sm:$0x1] %vm93_vm15, %v92_v30  }
  0x98   :  { %v98_v31 = vld [vmem:[#allocation0] sm:$0x1] }
  0x99   :  { %100 = vst [vmem:[%s208_s1] sm:$0x1] %v98_v31 }

// kernel: dwconv_mulit.1
= control target key start
LH: loop header
LB: loop body
LE: loop exit
PB: predicated region body
PF: predicated region fallthrough
CT: control target
= control target key end

     0   :  { %s666_s12 = smov 0   ;;  %s825_s0 = inlined_call_operand.vmem [shape: f32[2,16,128], index: 0, kind: input, shape index: {}]   ;;  %s826_s1 = inlined_call_operand.vmem [shape: f32[3,3,128], index: 1, kind: input, shape index: {}]   ;;  %s827_s2 = inlined_call_operand.vmem [shape: f32[1,128], index: 2, kind: input, shape index: {}]   ;;  %s828_s3 = inlined_call_operand.vmem [shape: f32[2,16,128], index: 3, kind: output, shape index: {}]  }
   0x1 LB: > { %s591_s13 = sadd.s32 4294967295, %s639_s12   ;;  %p595_p0 = scmp.ge.s32.totalorder %s639_s12, 1  ;;  %s639_s12 = sphi %s666_s12, %s13_s12  }
   0x2   : > { %p137_p1 = scmp.lt.s32.totalorder %s639_s12, 3 }
   0x4   : > { %p138_p2 = pnand %p595_p0, %p137_p1 }
   0x5   : > { %p161_p3 = scmp.lt.s32.totalorder (!%p138_p2), %s591_s13, 1  ;;  %v171_v0 = vlaneseq (!%p138_p2)  ;;  %vm183_vm0 = vcmask (!%p138_p2), 58368   ;;  %v641_v1 = vmov (!%p138_p2), 0.0   ;;  %vm188_vm2 = vcmask (!%p138_p2), 123968   ;;  %s642_s18 = smov (!%p138_p2), 8  }
   0x6   : > { %141 = sbr.rel (%p138_p2) target bundleno = 310 (0x136), region = 32  ;;  %vm180_vm3 = vcmask (!%p138_p2), 64512   ;;  %vm185_vm4 = vcmask (!%p138_p2), 130112   ;;  %vm194_vm5 = vcmask (!%p138_p2), 1040384   ;;  %v608_v6 = vld [vmem:[%s826_s1 + $0x1] ss:$0 sm:$0xff] (!%p138_p2) }
   0x7   : > { %vm173_vm1 = vcmp.lt.s32.totalorder (!%p138_p2), %v171_v0, 144  ;;  %182 = vst.msk [vmem:[#allocation2 + $0x10] sm:$0xff] (!%p138_p2), %vm180_vm3, %v641_v1  ;;  %v611_v8 = vld [vmem:[%s826_s1 + $0x5] ss:$0 sm:$0xff] (!%p138_p2)  ;;  %v609_v9 = vld [vmem:[%s826_s1 + $0x2] ss:$0 sm:$0xff] (!%p138_p2) }
   0x8   : > { %178 = vst.msk [vmem:[#allocation2 + $0x21] ss:$8 sm:$0x3] (!%p138_p2), %vm173_vm1, %v641_v1  ;;  %175 = vst.msk [vmem:[#allocation2] ss:$8 sm:$0x3] (!%p138_p2), %vm173_vm1, %v641_v1 }
   0x9   : > { %184 = vst.msk [vmem:[#allocation2 + $0x20] sm:$0x3] (!%p138_p2), %vm183_vm0, %v641_v1  ;;  %s643_s25 = smov (!%p138_p2), 16   ;;  %v614_v10 = vld [vmem:[%s826_s1 + $0x9] ss:$0 sm:$0xff] (!%p138_p2)  ;;  %vm214_vm6 = vcmask (!%p138_p2), 1040448  }
   0xa   : > { %189 = vst.msk [vmem:[#allocation2 + $0x28] sm:$0x3] (!%p138_p2), %vm188_vm2, %v641_v1  ;;  %v612_v11 = vld [vmem:[%s826_s1 + $0x6] ss:$0 sm:$0xff] (!%p138_p2)  ;;  %v615_v12 = vld [vmem:[%s826_s1 + $0xa] ss:$0 sm:$0xff] (!%p138_p2) }
   0xb   : > { %181 = vst.msk [vmem:[#allocation2] sm:$0xff] (!%p138_p2), %vm180_vm3, %v641_v1  ;;  %vm216_vm7 = vcmask (!%p138_p2), 57344   ;;  %vm207_vm8 = vcmask (!%p138_p2), 1047617   ;;  %vm209_vm9 = vcmask (!%p138_p2), 64513   ;;  %vm211_vm10 = vcmask (!%p138_p2), 1047616   ;;  %s644_s5 = smov (!%p138_p2), 120  }
   0xc   : > { %186 = vst.msk [vmem:[#allocation2 + $0x8] sm:$0xff] (!%p138_p2), %vm185_vm4, %v641_v1  ;;  %187 = vst.msk [vmem:[#allocation2 + $0x18] sm:$0xff] (!%p138_p2), %vm185_vm4, %v641_v1  ;;  %s645_s6 = smov (!%p138_p2), 112   ;;  %v610_v38 = vld [vmem:[%s826_s1 + $0x4] ss:$0 sm:$0xff] (!%p138_p2)  ;;  %vm322_vm11 = vcmask (!%p138_p2), 1046528  }
   0xd   : > { %s830_s13 = smov (!%p161_p3, %s591_s13), 1  ;;  %v613_v54 = vld [vmem:[%s826_s1 + $0x8] ss:$0 sm:$0xff]  ;;  %vm434_vm12 = vcmask 1045504   ;;  %vm272_vm13 = vcmask 982016   ;;  %vm303_vm14 = vcmask 916480  }
   0xe   : > { %s618_s14 = sshll.u32 %s830_s13, 4 }
   0xf   : > { %s165_s17 = scalar_lea.vmem %s825_s0, %s618_s14  ;;  %s170_s20 = scalar_lea.vmem %s828_s3, %s618_s14 }
  0x10   : > { %v191_v2 = vld [vmem:[%s165_s17 + $0x8] sm:$0xff]  ;;  %v190_v3 = vld [vmem:[%s165_s17] sm:$0xff] }
  0x11   : > { %v196_v4 = vrot.slane %v191_v2, 7  ;;  %v195_v5 = vrot.slane %v190_v3, 7 }
  0x13   : > { %202 = vrot.lane.b32.xlu1 %v196_v4, %s642_s18  ;;  %198 = vrot.lane.b32.xlu0 %v195_v5, %s642_s18  ;;  %v197_v7 = vsel %vm194_vm5, %v195_v5, %v196_v4 }
  0x17   : > { %253 = vrot.lane.b32.xlu1 %v608_v6, %s642_s18  ;;  %200 = vrot.lane.b32.xlu0 %v197_v7, %s642_s18 }
  0x1b   : > { %339 = vrot.lane.b32.xlu1 %v611_v8, %s642_s18  ;;  %284 = vrot.lane.b32.xlu0 %v609_v9, %s643_s25 }
  0x1f   : > { %451 = vrot.lane.b32.xlu1 %v614_v10, %s642_s18  ;;  %383 = vrot.lane.b32.xlu0 %v612_v11, %s643_s25 }
  0x23   : > { %495 = vrot.lane.b32.xlu0 %v615_v12, %s643_s25 }
  0x85   : > { %v203_v13 = vpop.permute.xlu1 %202  ;;  %v199_v14 = vpop.permute.xlu0 %198 }
  0x86   : > { %215 = vst.msk [vmem:[#allocation2 + $0x20] sm:$0x1] %vm214_vm6, %v203_v13 }
  0x87   : > { %217 = vst.msk [vmem:[#allocation2 + $0x28] sm:$0x1] %vm216_vm7, %v203_v13 }
  0x88   : > { %208 = vst.msk [vmem:[#allocation2] sm:$0xfe] %vm207_vm8, %v199_v14 }
  0x89   : > { %210 = vst.msk [vmem:[#allocation2 + $0x8] sm:$0xfe] %vm209_vm9, %v199_v14  ;;  %v201_v15 = vpop.permute.xlu0 %200  ;;  %v254_v16 = vpop.permute.xlu1 %253 }
  0x8a   : > { %212 = vst.msk [vmem:[#allocation2 + $0x10] sm:$0xff] %vm211_vm10, %v201_v15 }
  0x8b   : > { %213 = vst.msk [vmem:[#allocation2 + $0x18] sm:$0xff] %vm180_vm3, %v201_v15 }
  0x8d   : > { %v285_v21 = vpop.permute.xlu0 %284  ;;  %v340_v26 = vpop.permute.xlu1 %339  ;;  %v311_v34 = vld [vmem:[#allocation2 + $0x20] sm:$0x1] }
  0x8e   : > { %v333_v33 = vld [vmem:[#allocation2 + $0x28] sm:$0x1]  ;;  %v346_v44 = vmul.f32 %v340_v26, %v311_v34  ;;  %v318_v47 = vmul.f32 %v610_v38, %v311_v34  ;;  %v739_v61 = vld [vmem:[#allocation2 + $0x20] sm:$0x3] }
  0x8f   : > { %v703_v17 = vld [vmem:[#allocation2] sm:$0xff]  ;;  %v347_v43 = vmul.f32 %v340_v26, %v333_v33  ;;  %v430_v11 = vmul.f32 %v613_v54, %v739_v61 }
  0x90   : > { %v246_v18 = vld [vmem:[#allocation2 + $0x8] sm:$0xff]  ;;  %v256_v19 = vmul.f32 %v254_v16, %v703_v17  ;;  %v287_v23 = vmul.f32 %v285_v21, %v703_v17  ;;  %v310_v30 = vld [vmem:[#allocation2] sm:$0xfe]  ;;  %v360_v58 = vrot.slane %v346_v44, 1  ;;  %v326_v2 = vrot.slane %v318_v47, 1 }
  0x91   : > { %v257_v20 = vmul.f32 %v254_v16, %v246_v18  ;;  %v288_v22 = vmul.f32 %v285_v21, %v246_v18  ;;  %v711_v25 = vld [vmem:[#allocation2 + $0x10] sm:$0xff]  ;;  %v332_v29 = vld [vmem:[#allocation2 + $0x8] sm:$0xfe]  ;;  %v384_v35 = vpop.permute.xlu0 %383  ;;  %v342_v37 = vmul.f32 %v340_v26, %v310_v30  ;;  %v316_v46 = vmul.f32 %v610_v38, %v310_v30  ;;  %v730_v53 = vld [vmem:[#allocation2] sm:$0xfc]  ;;  %v452_v8 = vpop.permute.xlu1 %451 }
  0x92   : > { %264 = vrot.lane.b32.xlu1 %v256_v19, %s644_s5  ;;  %v709_v24 = vld [vmem:[#allocation2 + $0x18] sm:$0xff]  ;;  %v258_v28 = vmul.f32 %v254_v16, %v711_v25  ;;  %v344_v32 = vmul.f32 %v340_v26, %v711_v25  ;;  %v343_v36 = vmul.f32 %v340_v26, %v332_v29  ;;  %v289_v40 = vmul.f32 %v285_v21, %v711_v25  ;;  %v444_v19 = vld [vmem:[#allocation2 + $0x8] sm:$0xfc] }
  0x93   : > { %266 = vrot.lane.b32.xlu0 %v257_v20, %s644_s5  ;;  %v259_v27 = vmul.f32 %v254_v16, %v709_v24  ;;  %v345_v31 = vmul.f32 %v340_v26, %v709_v24  ;;  %v290_v39 = vmul.f32 %v285_v21, %v709_v24  ;;  %v387_v45 = vmul.f32 %v384_v35, %v332_v29 }
  0x94   : > { %v355_v42 = vrot.slane %v344_v32, 1  ;;  %v357_v48 = vrot.slane %v343_v36, 1  ;;  %v354_v49 = vrot.slane %v342_v37, 1  ;;  %v389_v50 = vmul.f32 %v384_v35, %v709_v24 }
  0x95   : > { %v358_v41 = vrot.slane %v345_v31, 1  ;;  %v386_v51 = vmul.f32 %v384_v35, %v310_v30  ;;  %v388_v52 = vmul.f32 %v384_v35, %v711_v25  ;;  %v362_v57 = vrot.slane %v347_v43, 1  ;;  %v445_v30 = vld [vmem:[#allocation2 + $0x28] sm:$0x3]  ;;  %v496_v36 = vpop.permute.xlu0 %495 }
  0x96   : > { %295 = vrot.lane.b32.xlu1 %v287_v23, %s645_s6  ;;  %v356_v56 = vsel %vm322_vm11, %v354_v49, %v355_v42  ;;  %v401_v59 = vrot.slane %v387_v45, 1  ;;  %v391_v60 = vmul.f32 %v384_v35, %v333_v33  ;;  %v317_v62 = vmul.f32 %v610_v38, %v711_v25 }
  0x97   : > { %297 = vrot.lane.b32.xlu0 %v288_v22, %s645_s6  ;;  %v359_v55 = vsel %vm322_vm11, %v357_v48, %v358_v41  ;;  %v323_v63 = vrot.slane %v316_v46, 1  ;;  %v402_v0 = vrot.slane %v389_v50, 1  ;;  %v398_v1 = vrot.slane %v386_v51, 1 }
  0x98   : > { %v428_v3 = vmul.f32 %v613_v54, %v730_v53  ;;  %v399_v4 = vrot.slane %v388_v52, 1  ;;  %v390_v5 = vmul.f32 %v384_v35, %v311_v34  ;;  %v324_v6 = vrot.slane %v317_v62, 1 }
  0x99   : > { %v429_v7 = vmul.f32 %v613_v54, %v711_v25  ;;  %v363_v9 = vsel %vm322_vm11, %v358_v41, %v362_v57  ;;  %v361_v10 = vsel %vm322_vm11, %v355_v42, %v360_v58  ;;  %v403_v16 = vsel %vm322_vm11, %v401_v59, %v402_v0 }
  0x9a   : > { %268 = vrot.lane.b32.xlu1 %v258_v28, %s644_s5  ;;  %v750_v12 = vsel %vm322_vm11, %v323_v63, %v324_v6  ;;  %v753_v13 = vsel %vm322_vm11, %v324_v6, %v326_v2  ;;  %v435_v14 = vrot.slane %v428_v3, 2  ;;  %v406_v18 = vrot.slane %v391_v60, 1 }
  0x9b   : > { %270 = vrot.lane.b32.xlu0 %v259_v27, %s644_s5  ;;  %v436_v15 = vrot.slane %v429_v7, 2  ;;  %v438_v20 = vrot.slane %v430_v11, 2  ;;  %v400_v21 = vsel %vm322_vm11, %v398_v1, %v399_v4  ;;  %v404_v22 = vrot.slane %v390_v5, 1 }
  0x9c   : > { %v455_v23 = vmul.f32 %v452_v8, %v444_v19  ;;  %v457_v27 = vmul.f32 %v452_v8, %v709_v24  ;;  %v454_v28 = vmul.f32 %v452_v8, %v730_v53  ;;  %v456_v29 = vmul.f32 %v452_v8, %v711_v25 }
  0x9d   : > { %v758_v26 = vsel %vm434_vm12, %v435_v14, %v436_v15  ;;  %v764_v31 = vsel %vm434_vm12, %v436_v15, %v438_v20  ;;  %v407_v32 = vsel %vm322_vm11, %v402_v0, %v406_v18  ;;  %v405_v33 = vsel %vm322_vm11, %v399_v4, %v404_v22  ;;  %v607_v0 = vld [vmem:[%s827_s2] ss:$0 sm:$0xff] }
  0x9e   : > { %299 = vrot.lane.b32.xlu1 %v289_v40, %s645_s6  ;;  %v459_v34 = vmul.f32 %v452_v8, %v445_v30  ;;  %v458_v35 = vmul.f32 %v452_v8, %v739_v61  ;;  %v469_v37 = vrot.slane %v455_v23, 2  ;;  %v470_v38 = vrot.slane %v457_v27, 2 }
  0x9f   : > { %301 = vrot.lane.b32.xlu0 %v290_v39, %s645_s6  ;;  %v466_v39 = vrot.slane %v454_v28, 2  ;;  %v467_v40 = vrot.slane %v456_v29, 2  ;;  %v499_v43 = vmul.f32 %v496_v36, %v444_v19  ;;  %v501_v44 = vmul.f32 %v496_v36, %v709_v24 }
  0xa0   : > { %v474_v41 = vrot.slane %v459_v34, 2  ;;  %v472_v42 = vrot.slane %v458_v35, 2  ;;  %v471_v45 = vsel %vm434_vm12, %v469_v37, %v470_v38  ;;  %v498_v47 = vmul.f32 %v496_v36, %v730_v53 }
  0xa1   : > { %v468_v46 = vsel %vm434_vm12, %v466_v39, %v467_v40  ;;  %v500_v48 = vmul.f32 %v496_v36, %v711_v25  ;;  %v513_v51 = vrot.slane %v499_v43, 2  ;;  %v514_v52 = vrot.slane %v501_v44, 2 }
  0xa2   : > { %364 = vrot.lane.b32.xlu1 %v356_v56, %s644_s5  ;;  %v475_v49 = vsel %vm434_vm12, %v470_v38, %v474_v41  ;;  %v473_v50 = vsel %vm434_vm12, %v467_v40, %v472_v42  ;;  %v510_v54 = vrot.slane %v498_v47, 2  ;;  %v502_v56 = vmul.f32 %v496_v36, %v739_v61  ;;  %v606_v61 = vld [vmem:[%s826_s1] ss:$0 sm:$0xff] }
  0xa3   : > { %366 = vrot.lane.b32.xlu0 %v359_v55, %s644_s5  ;;  %v511_v24 = vrot.slane %v500_v48, 2  ;;  %v503_v55 = vmul.f32 %v496_v36, %v445_v30  ;;  %v515_v53 = vsel %vm434_vm12, %v513_v51, %v514_v52  ;;  %v236_v63 = vmul.f32 %v606_v61, %v703_v17 }
  0xa4   : > { %v516_v59 = vrot.slane %v502_v56, 2 }
  0xa5   : > { %v512_v57 = vsel %vm434_vm12, %v510_v54, %v511_v24  ;;  %v518_v58 = vrot.slane %v503_v55, 2  ;;  %v244_v4 = vadd.f32 %v607_v0, %v236_v63 }
  0xa6   : > { %368 = vrot.lane.b32.xlu1 %v361_v10, %s644_s5  ;;  %v517_v62 = vsel %vm434_vm12, %v511_v24, %v516_v59  ;;  %v237_v10 = vmul.f32 %v606_v61, %v711_v25 }
  0xa7   : > { %370 = vrot.lane.b32.xlu0 %v363_v9, %s644_s5  ;;  %v519_v60 = vsel %vm434_vm12, %v514_v52, %v518_v58 }
  0xaa   : > { %408 = vrot.lane.b32.xlu1 %v400_v21, %s645_s6 }
  0xab   : > { %410 = vrot.lane.b32.xlu0 %v403_v16, %s645_s6  ;;  %v245_v16 = vadd.f32 %v607_v0, %v237_v10 }
  0xae   : > { %412 = vrot.lane.b32.xlu1 %v405_v33, %s645_s6 }
  0xaf   : > { %414 = vrot.lane.b32.xlu0 %v407_v32, %s645_s6 }
  0xb2   : > { %476 = vrot.lane.b32.xlu1 %v468_v46, %s644_s5 }
  0xb3   : > { %478 = vrot.lane.b32.xlu0 %v471_v45, %s644_s5 }
  0xb6   : > { %480 = vrot.lane.b32.xlu1 %v473_v50, %s644_s5 }
  0xb7   : > { %482 = vrot.lane.b32.xlu0 %v475_v49, %s644_s5 }
  0xba   : > { %520 = vrot.lane.b32.xlu1 %v512_v57, %s645_s6 }
  0xbb   : > { %522 = vrot.lane.b32.xlu0 %v515_v53, %s645_s6 }
  0xbe   : > { %524 = vrot.lane.b32.xlu1 %v517_v62, %s645_s6 }
  0xbf   : > { %526 = vrot.lane.b32.xlu0 %v519_v60, %s645_s6 }
 0x104   : > { %v265_v1 = vpop.permute.xlu1 %264 }
 0x105   : > { %v267_v2 = vpop.permute.xlu0 %266 }
 0x106   : > { %v273_v3 = vsel %vm272_vm13, %v265_v1, %v267_v2 }
 0x107   : > { %v277_v5 = vadd.f32 %v273_v3, %v244_v4 }
 0x108   : > { %v296_v6 = vpop.permute.xlu1 %295 }
 0x109   : > { %v298_v7 = vpop.permute.xlu0 %297 }
 0x10a   : > { %v304_v8 = vsel %vm303_vm14, %v296_v6, %v298_v7 }
 0x10b   : > { %v308_v9 = vadd.f32 %v304_v8, %v277_v5 }
 0x10c   : > { %v269_v17 = vpop.permute.xlu1 %268 }
 0x10d   : > { %v271_v11 = vpop.permute.xlu0 %270  ;;  %v330_v14 = vadd.f32 %v750_v12, %v308_v9 }
 0x10e   : > { %v274_v15 = vsel %vm272_vm13, %v269_v17, %v271_v11 }
 0x10f   : > { %v278_v18 = vadd.f32 %v274_v15, %v245_v16 }
 0x110   : > { %v300_v19 = vpop.permute.xlu1 %299 }
 0x111   : > { %v302_v20 = vpop.permute.xlu0 %301 }
 0x112   : > { %v305_v21 = vsel %vm303_vm14, %v300_v19, %v302_v20 }
 0x113   : > { %v309_v22 = vadd.f32 %v305_v21, %v278_v18 }
 0x114   : > { %v365_v23 = vpop.permute.xlu1 %364 }
 0x115   : > { %v367_v27 = vpop.permute.xlu0 %366  ;;  %v331_v28 = vadd.f32 %v753_v13, %v309_v22 }
 0x116   : > { %v372_v25 = vsel %vm272_vm13, %v365_v23, %v367_v27 }
 0x117   : > { %v376_v32 = vadd.f32 %v372_v25, %v330_v14 }
 0x118   : > { %v369_v29 = vpop.permute.xlu1 %368 }
 0x119   : > { %v371_v30 = vpop.permute.xlu0 %370 }
 0x11a   : > { %v373_v34 = vsel %vm272_vm13, %v369_v29, %v371_v30 }
 0x11b   : > { %v377_v37 = vadd.f32 %v373_v34, %v331_v28 }
 0x11c   : > { %v409_v33 = vpop.permute.xlu1 %408 }
 0x11d   : > { %v411_v12 = vpop.permute.xlu0 %410 }
 0x11e   : > { %v416_v35 = vsel %vm303_vm14, %v409_v33, %v411_v12 }
 0x11f   : > { %v420_v36 = vadd.f32 %v416_v35, %v376_v32 }
 0x120   : > { %v413_v38 = vpop.permute.xlu1 %412 }
 0x121   : > { %v415_v39 = vpop.permute.xlu0 %414  ;;  %v442_v40 = vadd.f32 %v758_v26, %v420_v36 }
 0x122   : > { %v417_v13 = vsel %vm303_vm14, %v413_v38, %v415_v39 }
 0x123   : > { %v421_v41 = vadd.f32 %v417_v13, %v377_v37 }
 0x124   : > { %v477_v42 = vpop.permute.xlu1 %476 }
 0x125   : > { %v479_v43 = vpop.permute.xlu0 %478  ;;  %v443_v44 = vadd.f32 %v764_v31, %v421_v41 }
 0x126   : > { %v484_v47 = vsel %vm272_vm13, %v477_v42, %v479_v43 }
 0x127   : > { %v488_v48 = vadd.f32 %v484_v47, %v442_v40 }
 0x128   : > { %v481_v45 = vpop.permute.xlu1 %480 }
 0x129   : > { %v483_v46 = vpop.permute.xlu0 %482 }
 0x12a   : > { %v485_v26 = vsel %vm272_vm13, %v481_v45, %v483_v46 }
 0x12b   : > { %v489_v54 = vadd.f32 %v485_v26, %v443_v44 }
 0x12c   : > { %v521_v49 = vpop.permute.xlu1 %520 }
 0x12d   : > { %v523_v50 = vpop.permute.xlu0 %522 }
 0x12e   : > { %v528_v51 = vsel %vm303_vm14, %v521_v49, %v523_v50 }
 0x12f   : > { %v532_v52 = vadd.f32 %v528_v51, %v488_v48 }
 0x130   : > { %v525_v31 = vpop.permute.xlu1 %524 }
 0x131   : > { %534 = vst [vmem:[%s170_s20] sm:$0xff] %v532_v52  ;;  %v527_v24 = vpop.permute.xlu0 %526 }
 0x132   : > { %v529_v55 = vsel %vm303_vm14, %v525_v31, %v527_v24 }
 0x133   : > { %v533_v56 = vadd.f32 %v529_v55, %v489_v54 }
 0x135   : > { %535 = vst [vmem:[%s170_s20 + $0x8] sm:$0xff] %v533_v56 }
 0x136 PF: > { %s13_s12 = sadd.s32 1, %s639_s12  }
 0x137   : > { %p10_p4 = scmp.ge.s32.totalorder %s13_s12, 4  }
 0x139   :  { %12 = sbr.rel (!%p10_p4) target bundleno = 1 (0x1), region = 65 }

</bundles_post_ra>
